<compile_context>
chip_gen: v7x
topology: tpu7x:2x2x1
jax: 0.10.0
libtpu: 0.0.40
codegen_flags: <defaults>
</compile_context>

<pallas_src>
import jax
import jax.numpy as jnp
from jax.experimental import pallas as pl
from jax.experimental.pallas import tpu as pltpu


def _round_up(x, m):
    return (x + m - 1) // m * m


def _cdiv(a, b):
    return -(-a // b)


def _vmem_capacity_bytes():
    try:
        info = pltpu.get_tpu_info()
        cap = getattr(info, "vmem_capacity_bytes", None)
        if cap:
            return int(cap)
    except Exception:
        pass
    return 64 * 2**20  # conservative fallback (v7x per-TC physical VMEM)


# --------------------- Path A: fused operator resident in VMEM ---------------------
def _tagcn_resident_kernel(x_ref, m_ref, b_ref, o_ref):
    # x_ref: (br, CinV)      bf16   rows = (n, t), lanes = (i, v)
    # m_ref: (CinV, cols_p)  bf16   fused conv+graph operator, resident (index 0,0)
    # b_ref: (1, cols_p)     f32    hoisted bias
    # o_ref: (br, cols_p)           lane-dense output, lanes = (c, w)
    acc = jnp.dot(x_ref[...], m_ref[...], preferred_element_type=jnp.float32)
    o_ref[...] = (acc + b_ref[...]).astype(o_ref.dtype)


# --------------- Path B: streamed, contraction-tiled over C_in*V -------------------
def _tagcn_ktiled_kernel(x_ref, m_ref, b_ref, o_ref, acc_ref):
    k = pl.program_id(2)

    @pl.when(k == 0)
    def _():
        acc_ref[...] = jnp.zeros_like(acc_ref)

    acc_ref[...] += jnp.dot(x_ref[...], m_ref[...], preferred_element_type=jnp.float32)

    @pl.when(k == pl.num_programs(2) - 1)
    def _():
        o_ref[...] = (acc_ref[...] + b_ref[...]).astype(o_ref.dtype)


def adaptive_conv_temporal_graphical(
    x, W, bias, B_adj, *,
    block_rows=512, block_cols=512, k_tile=512,
    out_dtype=None, force_stream=False,
):
    """x: (N, C_in, T, V); W: (K, C_out, C_in); bias: (K*C_out,); B_adj: (K, V, V)."""
    N, C_in, T, V = x.shape
    K, Cout, _ = W.shape
    CinV, CoutV = C_in * V, Cout * V
    out_dtype = x.dtype if out_dtype is None else out_dtype
    out_itemsize = jnp.dtype(out_dtype).itemsize

    Wf = W.astype(jnp.float32)
    Af = B_adj.astype(jnp.float32)

    # Fused operator: M[(i,v),(c,w)] = sum_k W[k,c,i] * A[k,v,w]   (k-sum in f32)
    M = jnp.einsum("kci,kvw->ivcw", Wf, Af).reshape(CinV, CoutV)
    # Hoisted bias: b2[c,w] = sum_{k,v} bias[k*Cout+c] * A[k,v,w]
    b2 = jnp.einsum("kc,kvw->cw",
                    bias.reshape(K, Cout).astype(jnp.float32), Af).reshape(1, CoutV)

    rows = N * T
    # Rows = (n, t); lane-dense columns = (i, v).  Single fused XLA copy.
    xr = jnp.transpose(x, (0, 2, 1, 3)).reshape(rows, CinV).astype(jnp.bfloat16)

    cols_p = _round_up(CoutV, 128)                 # lane-dense output columns
    Mp = jnp.pad(M, ((0, 0), (0, cols_p - CoutV))).astype(jnp.bfloat16)
    b2p = jnp.pad(b2, ((0, 0), (0, cols_p - CoutV)))

    vmem_cap = _vmem_capacity_bytes()
    vmem_budget = min(int(vmem_cap * 0.65), 100 * 2**20)  # ~42 MiB v7x, ~83 MiB v5e/v6e

    def pick_br(target):
        # bf16 second-minor tile = 16; prefer >=2 row blocks for the 2 v7x TCs.
        if rows <= 16:
            return rows
        br_ = _round_up(min(target, rows), 16)
        if _cdiv(rows, br_) < 2:
            br_ = _round_up(_cdiv(rows, 2), 16)
        return min(br_, _round_up(rows, 16))

    # ----------------------------- resident-M fast path ----------------------------
    def resident_footprint(br_):
        return (2 * br_ * CinV * 2          # x tiles (bf16, double-buffered)
                + 2 * CinV * cols_p * 2     # fused operator (counted conservatively 2x)
                + 2 * cols_p * 4            # hoisted bias
                + 2 * br_ * cols_p * out_itemsize)

    use_resident = not force_stream
    if use_resident:
        br = pick_br(block_rows)
        while resident_footprint(br) > vmem_budget and br > 16:
            br = _round_up(br // 2, 16)
        use_resident = resident_footprint(br) <= vmem_budget

    if use_resident:
        vmem_limit = int(min(max(resident_footprint(br) + (2 << 20), 32 * 2**20),
                             vmem_cap - (4 << 20)))
        out = pl.pallas_call(
            _tagcn_resident_kernel,
            out_shape=jax.ShapeDtypeStruct((rows, cols_p), out_dtype),
            grid_spec=pltpu.PrefetchScalarGridSpec(
                num_scalar_prefetch=0,
                grid=(_cdiv(rows, br),),
                in_specs=[
                    pl.BlockSpec((br, CinV), lambda i: (i, 0)),
                    pl.BlockSpec((CinV, cols_p), lambda i: (0, 0)),   # resident: DMA'd once
                    pl.BlockSpec((1, cols_p), lambda i: (0, 0)),      # resident bias
                ],
                out_specs=pl.BlockSpec((br, cols_p), lambda i: (i, 0)),
            ),
            compiler_params=pltpu.CompilerParams(
                dimension_semantics=("parallel",),
                vmem_limit_bytes=vmem_limit,
            ),
        )(xr, Mp, b2p)
    else:
        # -------------------- streamed / contraction-tiled fallback ----------------
        bc = min(_round_up(block_cols, 128), cols_p)
        while cols_p % bc:
            bc -= 128                               # keep full lane-dense output blocks

        grain = 128
        tk = min(_round_up(k_tile, grain), _round_up(CinV, grain))
        CinV_p = _round_up(CinV, tk)

        def stream_footprint(br_):
            return (2 * br_ * tk * 2 + 2 * tk * bc * 2 + 2 * bc * 4
                    + 2 * br_ * bc * out_itemsize + br_ * bc * 4)

        br = pick_br(max(block_rows, bc))           # held block >= streamed block
        while stream_footprint(br) > vmem_budget and br > 16:
            br = _round_up(br // 2, 16)

        xr_p = jnp.pad(xr, ((0, 0), (0, CinV_p - CinV))) if CinV_p != CinV else xr
        Mp_k = jnp.pad(Mp, ((0, CinV_p - CinV), (0, 0))) if CinV_p != CinV else Mp

        vmem_limit = int(min(max(stream_footprint(br) + (2 << 20), 32 * 2**20),
                             vmem_cap - (4 << 20)))
        out = pl.pallas_call(
            _tagcn_ktiled_kernel,
            out_shape=jax.ShapeDtypeStruct((rows, cols_p), out_dtype),
            grid_spec=pltpu.PrefetchScalarGridSpec(
                num_scalar_prefetch=0,
                grid=(_cdiv(rows, br), cols_p // bc, CinV_p // tk),
                in_specs=[
                    pl.BlockSpec((br, tk), lambda i, j, k: (i, k)),
                    pl.BlockSpec((tk, bc), lambda i, j, k: (k, j)),
                    pl.BlockSpec((1, bc), lambda i, j, k: (0, j)),
                ],
                out_specs=pl.BlockSpec((br, bc), lambda i, j, k: (i, j)),
                scratch_shapes=[pltpu.VMEM((br, bc), jnp.float32)],
            ),
            compiler_params=pltpu.CompilerParams(
                dimension_semantics=("parallel", "parallel", "arbitrary"),
                vmem_limit_bytes=vmem_limit,
            ),
        )(xr_p, Mp_k, b2p)

    out = out[:, :CoutV].reshape(N, T, Cout, V)
    return jnp.transpose(out, (0, 2, 1, 3))


if __name__ == "__main__":
    def reference(x, W, bias, B_adj):
        K, Cout, _ = W.shape
        y = jnp.einsum("kci,nitv->nkctv", W, x) + bias.reshape(1, K, Cout, 1, 1)
        return jnp.einsum("nkctv,kvw->nctw", y, B_adj)

    key = jax.random.PRNGKey(0)
    kx, kw, kb, ka = jax.random.split(key, 4)

    # --- Test 1: module-consistent small shapes (resident-M fast path) ---
    N, C_in, T, V = 2, 4, 8, 16      # batch, in_channels, temporal length, graph nodes
    K, Cout = 3, 8                   # spatial kernel size, out_channels

    x = jax.random.normal(kx, (N, C_in, T, V), dtype=jnp.float32)
    W_conv = jax.random.normal(kw, (K * Cout, C_in, 1, 1), dtype=jnp.float32) * 0.1
    bias = jax.random.normal(kb, (K * Cout,), dtype=jnp.float32) * 0.1
    B_adj = jax.random.normal(ka, (K, V, V), dtype=jnp.float32) * 0.1
    W = W_conv.reshape(K, Cout, C_in)   # channel split matches x.view(n, K, Cout, t, v)

    out = jax.block_until_ready(adaptive_conv_temporal_graphical(x, W, bias, B_adj))
    ref = reference(x, W, bias, B_adj)
    assert out.shape == (N, Cout, T, V)
    assert jnp.allclose(out, ref, rtol=2e-2, atol=2e-2), float(jnp.max(jnp.abs(out - ref)))

    # --- Test 2: streamed / contraction-tiled fallback (partial row block + 2 k-steps) ---
    N2, C2, T2, V2 = 2, 16, 12, 16
    kx2, kw2, kb2, ka2 = jax.random.split(jax.random.PRNGKey(1), 4)
    x2 = jax.random.normal(kx2, (N2, C2, T2, V2), dtype=jnp.float32)
    W2 = jax.random.normal(kw2, (K, Cout, C2), dtype=jnp.float32) * 0.1
    bias2 = jax.random.normal(kb2, (K * Cout,), dtype=jnp.float32) * 0.1
    A2 = jax.random.normal(ka2, (K, V2, V2), dtype=jnp.float32) * 0.1

    out2 = jax.block_until_ready(adaptive_conv_temporal_graphical(
        x2, W2, bias2, A2, force_stream=True, block_rows=16, block_cols=128, k_tile=128))
    ref2 = reference(x2, W2, bias2, A2)
    assert out2.shape == (N2, Cout, T2, V2)
    assert jnp.allclose(out2, ref2, rtol=2e-2, atol=2e-2), float(jnp.max(jnp.abs(out2 - ref2)))

    print("KERNEL_OK")
</pallas_src>

<mosaic_0001>
module attributes {stable_mosaic.version = 11 : i64} {
  func.func @_tagcn_resident_kernel(%arg0: i32, %arg1: memref<16x64xbf16, #tpu.memory_space<vmem>>, %arg2: memref<64x128xbf16, #tpu.memory_space<vmem>>, %arg3: memref<1x128xf32, #tpu.memory_space<vmem>>, %arg4: memref<16x128xf32, #tpu.memory_space<vmem>>) attributes {dimension_semantics = [#tpu.dimension_semantics<parallel>], iteration_bounds = array<i64: 1>, scalar_prefetch = 0 : i64, scratch_operands = 0 : i64, tpu.core_type = #tpu.core_type<tc>, window_params = [{transform_indices = @transform_0, window_bounds = array<i64: 16, 64>}, {pipeline_mode = #tpu.pipeline_mode<synchronous>, transform_indices = @transform_1, window_bounds = array<i64: 64, 128>}, {pipeline_mode = #tpu.pipeline_mode<synchronous>, transform_indices = @transform_2, window_bounds = array<i64: 1, 128>}, {transform_indices = @transform_3, window_bounds = array<i64: 16, 128>}]} {
    %c0 = arith.constant 0 : index
    %c0_0 = arith.constant 0 : index
    %0 = vector.load %arg1[%c0, %c0_0] : memref<16x64xbf16, #tpu.memory_space<vmem>>, vector<16x64xbf16>
    %c0_1 = arith.constant 0 : index
    %c0_2 = arith.constant 0 : index
    %1 = vector.load %arg2[%c0_1, %c0_2] : memref<64x128xbf16, #tpu.memory_space<vmem>>, vector<64x128xbf16>
    %cst = arith.constant dense<0.000000e+00> : vector<16x128xf32>
    %2 = tpu.matmul %0, %1, %cst {dimension_numbers = #tpu.dot_dimension_numbers<[1], [0], [0], [1], [0, 0, 1, 1], [], []>} : vector<16x64xbf16>, vector<64x128xbf16>, vector<16x128xf32> -> vector<16x128xf32>
    %c0_3 = arith.constant 0 : index
    %c0_4 = arith.constant 0 : index
    %3 = vector.load %arg3[%c0_3, %c0_4] : memref<1x128xf32, #tpu.memory_space<vmem>>, vector<1x128xf32>
    %4 = vector.broadcast %3 : vector<1x128xf32> to vector<16x128xf32>
    %5 = arith.addf %2, %4 : vector<16x128xf32>
    %c0_5 = arith.constant 0 : index
    %c0_6 = arith.constant 0 : index
    %6 = vector.load %arg4[%c0_5, %c0_6] : memref<16x128xf32, #tpu.memory_space<vmem>>, vector<16x128xf32>
    tpu.vector_store %arg4[%c0_5, %c0_6], %5 {strides = array<i32>} : memref<16x128xf32, #tpu.memory_space<vmem>>, vector<16x128xf32>,
    return
  }
  func.func @transform_0(%arg0: i32) -> (i32, i32) {
    %c0_i32 = arith.constant 0 : i32
    %c0_i32_0 = arith.constant 0 : i32
    return %arg0, %c0_i32 : i32, i32
  }
  func.func @transform_1(%arg0: i32) -> (i32, i32) {
    %c0_i32 = arith.constant 0 : i32
    %c0_i32_0 = arith.constant 0 : i32
    %c0_i32_1 = arith.constant 0 : i32
    return %c0_i32, %c0_i32_0 : i32, i32
  }
  func.func @transform_2(%arg0: i32) -> (i32, i32) {
    %c0_i32 = arith.constant 0 : i32
    %c0_i32_0 = arith.constant 0 : i32
    %c0_i32_1 = arith.constant 0 : i32
    return %c0_i32, %c0_i32_0 : i32, i32
  }
  func.func @transform_3(%arg0: i32) -> (i32, i32) {
    %c0_i32 = arith.constant 0 : i32
    %c0_i32_0 = arith.constant 0 : i32
    return %arg0, %c0_i32 : i32, i32
  }
}

</mosaic_0001>

<bundles_post_ra>
// kernel: tpu_custom_call.1
= control target key start
LH: loop header
LB: loop body
LE: loop exit
PB: predicated region body
PF: predicated region fallthrough
CT: control target
= control target key end

     0   :  { %8 = vsyncpa [#allocation3], 0  ;;  %s333_s0 = inlined_call_operand.hbm [shape: bf16[16,64], index: 0, kind: input, shape index: {}]   ;;  %s334_s1 = inlined_call_operand.hbm [shape: bf16[64,128], index: 1, kind: input, shape index: {}]   ;;  %s335_s2 = inlined_call_operand.vmem [shape: f32[1,128], index: 2, kind: input, shape index: {}]   ;;  %s336_s3 = inlined_call_operand.hbm [shape: f32[16,128], index: 3, kind: output, shape index: {}]  }
   0x1   :  { %9 = vsyncpa [#allocation6], 0 }
   0x2   :  { %10 = vsyncpa [#allocation4], 0  ;;  %s265_s12 = smov [#allocation2]   ;;  %s193_s16 = scalar_lea.hbm %s333_s0, 128 }
   0x3   :  { %s16_s13 = sshll.u32 %s265_s12, 4  ;;  %p194_p0 = scmp.ne.s32.totalorder %s333_s0, %s193_s16  ;;  %s17_s13 = int_to_ptr.vmem [resolvable:$true] %s16_s13 }
   0x4   :  { %p197_p1 = scmp.lt.u32.totalorder %s193_s16, %s333_s0 }
   0x6   :  { %p199_p2 = pnand %p197_p1, %p194_p0 }
   0x8   :  { %202 = shalt.err (!%p199_p2)
}
   0x9   :  { %s203_s21 = scalar_lea.vmem %s17_s13, 128  ;;  %p208_p4 = scmp.lt.s32.totalorder %s17_s13, %s17_s13 }
   0xa   :  { %p204_p3 = scmp.ne.s32.totalorder %s17_s13, %s203_s21  ;;  %p209_p5 = scmp.lt.s32.totalorder %s203_s21, %s203_s21 }
   0xc   :  { %p210_p6 = por %p209_p5, %p208_p4 }
   0xe   :  { %p211_p7 = pnand %p210_p6, %p204_p3 }
  0x10   :  { %214 = shalt.err (!%p211_p7)
}
  0x11   :  { %s266_s22 = smov 64   ;;  %s267_s23 = smov 4  }
  0x12   :  { %22 = dma.hbm_to_vmem [thread:$0]  %s333_s0, 128, %s17_s13, [#allocation3], %s266_s22, %s266_s22, %s267_s23  }
  0x13   :  { %s268_s26 = smov [#allocation5]   ;;  %s215_s30 = scalar_lea.hbm %s334_s1, 512 }
  0x14   :  { %s28_s27 = sshll.u32 %s268_s26, 4  ;;  %p216_p8 = scmp.ne.s32.totalorder %s334_s1, %s215_s30  ;;  %s29_s27 = int_to_ptr.vmem [resolvable:$true] %s28_s27 }
  0x15   :  { %p219_p9 = scmp.lt.u32.totalorder %s215_s30, %s334_s1 }
  0x17   :  { %p221_p10 = pnand %p219_p9, %p216_p8 }
  0x19   :  { %224 = shalt.err (!%p221_p10)
}
  0x1a   :  { %s225_s8 = scalar_lea.vmem %s29_s27, 512  ;;  %p230_p12 = scmp.lt.s32.totalorder %s29_s27, %s29_s27 }
  0x1b   :  { %p226_p11 = scmp.ne.s32.totalorder %s29_s27, %s225_s8  ;;  %p231_p13 = scmp.lt.s32.totalorder %s225_s8, %s225_s8 }
  0x1d   :  { %p232_p0 = por %p231_p13, %p230_p12 }
  0x1f   :  { %p233_p1 = pnand %p232_p0, %p226_p11 }
  0x21   :  { %236 = shalt.err (!%p233_p1)
}
  0x22   :  { %34 = dma.hbm_to_vmem [thread:$0]  %s334_s1, 512, %s29_s27, [#allocation6], %s266_s22, %s266_s22, %s267_s23  }
  0x23   :  { %259 = dma.done.wait [#allocation3], 128  }
  0x24   :  { %260 = vsyncadd [#allocation3], 4294967168 }
  0x25   :  { %261 = dma.done.wait [#allocation6], 512  }
  0x26   :  { %262 = vsyncadd [#allocation6], 4294966784  ;;  %v269_v0 = vmov 0.0   ;;  %vm270_vm0 = vmmov 0   ;;  %v188_v1 = vld [vmem:[#allocation5] sm:$0xff]   ;;  %v189_v2 = vld [vmem:[#allocation5 + $0x8] sm:$0xff]  }
  0x27   :  { %167 = vmatprep.subr.bf16.mxu0 %v269_v0  ;;  %175 = vmatprep.mubr.msk.bf16.mxu0 %vm270_vm0, %v269_v0  ;;  %v190_v3 = vld [vmem:[#allocation5 + $0x10] sm:$0xff]   ;;  %v191_v4 = vld [vmem:[#allocation5 + $0x18] sm:$0xff]   ;;  %vm90_vm1 = vcmask 523264   ;;  %s271_s11 = smov [#allocation7]  }
  0x28   :  { %168 = vmatpush3.bf16.msra.mxu0 %v188_v1  ;;  %v192_v5 = vld [vmem:[#allocation2] sm:$0xff]   ;;  %s142_s12 = sshll.u32 %s271_s11, 4  ;;  %s143_s12 = int_to_ptr.vmem [resolvable:$true] %s142_s12 }
  0x29   :  { %169 = vmatprep.subr.bf16.mxu0 %v269_v0  ;;  %v155_v6 = vld [vmem:[%s335_s2] ss:$0 sm:$0xff]  ;;  %s237_s13 = scalar_lea.vmem %s143_s12, 256  ;;  %p242_p3 = scmp.lt.s32.totalorder %s143_s12, %s143_s12 }
  0x2a   :  { %p238_p2 = scmp.ne.s32.totalorder %s143_s12, %s237_s13  ;;  %p243_p4 = scmp.lt.s32.totalorder %s237_s13, %s237_s13 }
  0x2c   :  { %170 = vmatpush3.bf16.msra.mxu0 %v189_v2  ;;  %p244_p5 = por %p243_p4, %p242_p3 }
  0x2d   :  { %171 = vmatprep.subr.bf16.mxu0 %v269_v0 }
  0x2e   :  { %p245_p6 = pnand %p244_p5, %p238_p2 }
  0x30   :  { %172 = vmatpush3.bf16.msra.mxu0 %v190_v3 }
  0x31   :  { %173 = vmatprep.subr.bf16.mxu0 %v269_v0 }
  0x34   :  { %174 = vmatpush3.bf16.msra.mxu0 %v191_v4 }
  0x37   :  { %176 = vmatmul.mubr.msk.bf16.vlgmr.msra.gmra.mrb[0].mxu0 %vm90_vm1, %v192_v5 }
 0x10a   :  { %v128_v7 = vpop.f32.mrb[0].mxu0 }
 0x10b   :  { %v129_v8 = vadd.f32 %v155_v6, %v128_v7  ;;  %v177_v9 = vpop.f32.mrb[1].mxu0 }
 0x10c   :  { %v131_v10 = vpop.f32.mrb[2].mxu0 }
 0x10d   :  { %135 = vst [vmem:[#allocation7] sm:$0xff] %v129_v8  ;;  %v132_v11 = vadd.f32 %v155_v6, %v131_v10  ;;  %v178_v12 = vpop.f32.mrb[3].mxu0 }
 0x10f   :  { %136 = vst [vmem:[#allocation7 + $0x8] sm:$0xff] %v132_v11 }
 0x110   :  { %248 = shalt.err (!%p245_p6)
}
 0x111   :  { %s249_s15 = scalar_lea.hbm %s336_s3, 256 }
 0x112   :  { %p250_p7 = scmp.ne.s32.totalorder %s336_s3, %s249_s15  ;;  %p253_p8 = scmp.lt.u32.totalorder %s249_s15, %s336_s3 }
 0x114   :  { %p255_p9 = pnand %p253_p8, %p250_p7 }
 0x116   :  { %258 = shalt.err (!%p255_p9)
}
 0x117   :  { %s272_s20 = smov 128   ;;  %s273_s21 = smov 8  }
 0x118   :  { %148 = dma.vmem_to_hbm [thread:$0]  %s143_s12, 256, %s336_s3, [#allocation4], %s272_s20, %s272_s20, %s273_s21  }
 0x119   :  { %263 = dma.done.wait [#allocation4], 256  }
 0x11a   :  { %264 = vsyncadd [#allocation4], 4294967040 }
 0x11b   :  { %152 = vsyncpa [#allocation3], 1 }
 0x11c   :  { %153 = vsyncpa [#allocation6], 1 }
 0x11d   :  { %154 = vsyncpa [#allocation4], 1 }

</bundles_post_ra>
